<compile_context>
chip_gen: v7x
topology: tpu7x:2x2x1
jax: 0.10.0
libtpu: 0.0.40
codegen_flags: <defaults>
</compile_context>

<pallas_src>
import math

import jax
import jax.numpy as jnp
from jax.experimental import pallas as pl
from jax.experimental.pallas import tpu as pltpu


def _round_up(n, m):
    return ((n + m - 1) // m) * m


def _relgraphconv_kernel(a_ref, h_ref, bias_ref, loopw_ref, fdst_ref, out_ref):
    """Grid: (dst_tiles, basis_groups, src_tiles). out_ref is the f32 accumulator."""
    b = pl.program_id(1)
    s = pl.program_id(2)

    # First reduction step of this dst tile: seed the accumulator with
    # bias + self-loop so this small matmul overlaps the next A-tile DMA.
    @pl.when(jnp.logical_and(b == 0, s == 0))
    def _():
        out_ref[...] = bias_ref[...] + jnp.dot(
            fdst_ref[...], loopw_ref[...], preferred_element_type=jnp.float32)

    # Accumulate `bb` bases per grid step (back-to-back MXU dots, static
    # unroll) -- halves grid-step count vs one basis per step.
    bb = a_ref.shape[0]
    for j in range(bb):
        out_ref[...] += jnp.dot(
            a_ref[j], h_ref[j], preferred_element_type=jnp.float32)


def cugraph_relgraphconv_forward(src, dst, etypes, feat, coeff, W, h_bias,
                                 loop_weight, num_dst=None):
    """Forward pass of CuGraphRelGraphConv (basis regularizer, eval mode)."""
    num_src, in_feat = feat.shape
    num_bases, _, out_feat = W.shape
    if num_dst is None:
        num_dst = num_src

    # lane-dense / MXU-friendly padding
    in_pad = _round_up(in_feat, 128)
    out_pad = _round_up(out_feat, 128)

    # dst tile: as large as possible while keeping >= 2 tiles when there is
    # enough work, so the "parallel" dst axis feeds both v7x TensorCores.
    nd128 = _round_up(num_dst, 128)
    td = min(512, nd128)
    for cand in (512, 256, 128):
        if cand <= nd128 and nd128 // cand >= 2:
            td = cand
            break
    ts = min(1024, _round_up(num_src, 128))       # src tile (reduction axis)
    num_dst_pad = _round_up(num_dst, td)
    num_src_pad = _round_up(num_src, ts)

    # Fold pairs of bases into one grid step when possible.
    bb = 2 if num_bases % 2 == 0 else 1
    nb_grid = num_bases // bb

    # --- plain-JAX glue ------------------------------------------------------
    # Dense per-basis adjacency, built directly in bf16 (dominant HBM stream).
    # TODO(synk): for sparse graphs at scale, replace dense A with a CSR gather
    # using scalar-prefetched indptr/indices (removes O(B*N^2) bytes); further
    # shrink the stream with int8 (v5e/v6e) / fp8-e4m3 (v7x) A plus a
    # per-(basis, dst-tile) scale.
    edge_coeff = coeff[etypes].astype(jnp.bfloat16)            # (E, num_bases)
    A = jnp.zeros((num_bases, num_dst_pad, num_src_pad), jnp.bfloat16)
    A = A.at[:, dst, src].add(edge_coeff.T)

    featp = jnp.zeros((num_src_pad, in_pad), jnp.bfloat16)
    featp = featp.at[:num_src, :in_feat].set(feat.astype(jnp.bfloat16))
    Wp = jnp.zeros((num_bases, in_pad, out_pad), jnp.bfloat16)
    Wp = Wp.at[:, :in_feat, :out_feat].set(W.astype(jnp.bfloat16))

    # Hoisted basis projection: H[b] = feat @ W[b], computed once by XLA and
    # streamed to the kernel as bf16 tiles (replaces in-kernel recompute +
    # full-size VMEM scratch).
    H = jnp.einsum('sf,bfo->bso', featp, Wp,
                   preferred_element_type=jnp.float32).astype(jnp.bfloat16)

    fdstp = jnp.zeros((num_dst_pad, in_pad), jnp.bfloat16)
    fdstp = fdstp.at[:num_dst, :in_feat].set(feat[:num_dst].astype(jnp.bfloat16))
    loopwp = jnp.zeros((in_pad, out_pad), jnp.bfloat16)
    loopwp = loopwp.at[:in_feat, :out_feat].set(loop_weight.astype(jnp.bfloat16))
    biasp = jnp.zeros((1, out_pad), jnp.float32)
    biasp = biasp.at[0, :out_feat].set(h_bias.astype(jnp.float32))

    n_dt = num_dst_pad // td
    n_st = num_src_pad // ts

    grid_spec = pltpu.PrefetchScalarGridSpec(
        num_scalar_prefetch=0,
        grid=(n_dt, nb_grid, n_st),
        in_specs=[
            pl.BlockSpec((bb, td, ts), lambda i, b, s: (b, i, s)),       # A tile
            pl.BlockSpec((bb, ts, out_pad), lambda i, b, s: (b, s, 0)),  # H tile
            pl.BlockSpec((1, out_pad), lambda i, b, s: (0, 0)),          # bias
            pl.BlockSpec((in_pad, out_pad), lambda i, b, s: (0, 0)),     # loop W
            pl.BlockSpec((td, in_pad), lambda i, b, s: (i, 0)),          # dst feat
        ],
        out_specs=pl.BlockSpec((td, out_pad), lambda i, b, s: (i, 0)),
    )

    # Explicit VMEM budget (double-buffered pipelined blocks + constants):
    # floor above v5e's 16 MiB scoped default, cap below v7x's 64 MiB physical.
    vmem_need = (2 * bb * td * ts * 2            # A tiles
                 + 2 * bb * ts * out_pad * 2     # H tiles
                 + 2 * td * in_pad * 2           # dst feat tiles
                 + 2 * td * out_pad * 4          # out accumulator
                 + 2 * (out_pad * 4 + in_pad * out_pad * 2))   # bias + loop W
    vmem_limit = int(min(max(vmem_need + (4 << 20), 32 << 20), 48 << 20))

    flops = (2 * num_bases * num_dst_pad * num_src_pad * out_pad     # A_b @ H_b
             + 2 * num_dst_pad * in_pad * out_pad)                   # self-loop
    bytes_accessed = (A.size * 2 + n_dt * H.size * 2 + fdstp.size * 2
                      + loopwp.size * 2 + biasp.size * 4
                      + num_dst_pad * out_pad * 4)

    out = pl.pallas_call(
        _relgraphconv_kernel,
        out_shape=jax.ShapeDtypeStruct((num_dst_pad, out_pad), jnp.float32),
        grid_spec=grid_spec,
        compiler_params=pltpu.CompilerParams(
            dimension_semantics=("parallel", "arbitrary", "arbitrary"),
            vmem_limit_bytes=vmem_limit),
        cost_estimate=pl.CostEstimate(
            flops=flops, transcendentals=0, bytes_accessed=bytes_accessed),
    )(A, H, biasp, loopwp, fdstp)

    return out[:num_dst, :out_feat]


def reference_forward(src, dst, etypes, feat, coeff, W, h_bias, loop_weight):
    num_nodes, in_feat = feat.shape
    num_bases, _, out_feat = W.shape
    edge_coeff = coeff[etypes]                                # (E, num_bases)
    A = jnp.zeros((num_bases, num_nodes, num_nodes), jnp.float32)
    A = A.at[:, dst, src].add(edge_coeff.T)
    agg = jnp.einsum('bvu,uf->vbf', A, feat).reshape(num_nodes,
                                                     num_bases * in_feat)
    h = agg @ W.reshape(-1, out_feat)
    h = h + h_bias
    h = h + feat @ loop_weight
    return h


if __name__ == "__main__":
    key = jax.random.PRNGKey(0)
    k_feat, k_w, k_coeff, k_loop, k_src, k_dst, k_et = jax.random.split(key, 7)

    # small shapes consistent with the module
    num_nodes = 16
    num_edges = 32
    in_feat = 32
    out_feat = 8
    num_rels = 3
    num_bases = 2

    # deterministic parameter init mirroring the module's __init__
    bound_w = 1.0 / math.sqrt(in_feat)
    W = jax.random.uniform(k_w, (num_bases, in_feat, out_feat),
                           jnp.float32, -bound_w, bound_w)
    gain = math.sqrt(2.0)  # calculate_gain('relu')
    b_coeff = gain * math.sqrt(6.0 / (num_rels + num_bases))
    coeff = jax.random.uniform(k_coeff, (num_rels, num_bases),
                               jnp.float32, -b_coeff, b_coeff)
    h_bias = jnp.zeros((out_feat,), jnp.float32)
    b_loop = gain * math.sqrt(6.0 / (in_feat + out_feat))
    loop_weight = jax.random.uniform(k_loop, (in_feat, out_feat),
                                     jnp.float32, -b_loop, b_loop)

    # synthetic graph + features
    feat = jax.random.normal(k_feat, (num_nodes, in_feat), jnp.float32)
    src = jax.random.randint(k_src, (num_edges,), 0, num_nodes, jnp.int32)
    dst = jax.random.randint(k_dst, (num_edges,), 0, num_nodes, jnp.int32)
    etypes = jax.random.randint(k_et, (num_edges,), 0, num_rels, jnp.int32)

    out = cugraph_relgraphconv_forward(src, dst, etypes, feat, coeff, W,
                                       h_bias, loop_weight)
    out = jax.block_until_ready(out)

    ref = reference_forward(src, dst, etypes, feat, coeff, W, h_bias,
                            loop_weight)
    assert out.shape == (num_nodes, out_feat)
    # bf16 MXU inputs (f32 accumulation) -> relaxed tolerance vs f32 reference
    assert jnp.allclose(out, ref, atol=5e-2, rtol=5e-2), "mismatch vs reference"

    # TODO(synk): non-basis (regularizer=None) path and optional layer_norm /
    # activation / dropout / edge-norm are not exercised (module defaults used).
    print("KERNEL_OK")
</pallas_src>

<mosaic_0001>
module attributes {stable_mosaic.version = 11 : i64} {
  func.func @_relgraphconv_kernel(%arg0: i32, %arg1: i32, %arg2: i32, %arg3: memref<2x128x128xbf16, #tpu.memory_space<vmem>>, %arg4: memref<2x128x128xbf16, #tpu.memory_space<vmem>>, %arg5: memref<1x128xf32, #tpu.memory_space<vmem>>, %arg6: memref<128x128xbf16, #tpu.memory_space<vmem>>, %arg7: memref<128x128xbf16, #tpu.memory_space<vmem>>, %arg8: memref<128x128xf32, #tpu.memory_space<vmem>>) attributes {dimension_semantics = [#tpu.dimension_semantics<parallel>, #tpu.dimension_semantics<arbitrary>, #tpu.dimension_semantics<arbitrary>], iteration_bounds = array<i64: 1, 1, 1>, scalar_prefetch = 0 : i64, scratch_operands = 0 : i64, tpu.core_type = #tpu.core_type<tc>, window_params = [{transform_indices = @transform_0, window_bounds = array<i64: 2, 128, 128>}, {transform_indices = @transform_1, window_bounds = array<i64: 2, 128, 128>}, {pipeline_mode = #tpu.pipeline_mode<synchronous>, transform_indices = @transform_2, window_bounds = array<i64: 1, 128>}, {pipeline_mode = #tpu.pipeline_mode<synchronous>, transform_indices = @transform_3, window_bounds = array<i64: 128, 128>}, {transform_indices = @transform_4, window_bounds = array<i64: 128, 128>}, {transform_indices = @transform_5, window_bounds = array<i64: 128, 128>}]} {
    %c0_i32 = arith.constant 0 : i32
    %0 = arith.cmpi eq, %arg1, %c0_i32 : i32
    %c0_i32_0 = arith.constant 0 : i32
    %1 = arith.cmpi eq, %arg2, %c0_i32_0 : i32
    %2 = arith.andi %0, %1 : i1
    %3 = arith.extui %2 : i1 to i32
    %c0_i32_1 = arith.constant 0 : i32
    %4 = arith.cmpi ne, %3, %c0_i32_1 : i32
    scf.if %4 {
      %c0_21 = arith.constant 0 : index
      %c0_22 = arith.constant 0 : index
      %21 = vector.load %arg5[%c0_21, %c0_22] : memref<1x128xf32, #tpu.memory_space<vmem>>, vector<1x128xf32>
      %c0_23 = arith.constant 0 : index
      %c0_24 = arith.constant 0 : index
      %22 = vector.load %arg7[%c0_23, %c0_24] : memref<128x128xbf16, #tpu.memory_space<vmem>>, vector<128x128xbf16>
      %c0_25 = arith.constant 0 : index
      %c0_26 = arith.constant 0 : index
      %23 = vector.load %arg6[%c0_25, %c0_26] : memref<128x128xbf16, #tpu.memory_space<vmem>>, vector<128x128xbf16>
      %cst_27 = arith.constant dense<0.000000e+00> : vector<128x128xf32>
      %24 = tpu.matmul %22, %23, %cst_27 {dimension_numbers = #tpu.dot_dimension_numbers<[1], [0], [0], [1], [0, 0, 1, 1], [], []>} : vector<128x128xbf16>, vector<128x128xbf16>, vector<128x128xf32> -> vector<128x128xf32>
      %25 = vector.broadcast %21 : vector<1x128xf32> to vector<128x128xf32>
      %26 = arith.addf %25, %24 : vector<128x128xf32>
      %c0_28 = arith.constant 0 : index
      %c0_29 = arith.constant 0 : index
      %27 = vector.load %arg8[%c0_28, %c0_29] : memref<128x128xf32, #tpu.memory_space<vmem>>, vector<128x128xf32>
      tpu.vector_store %arg8[%c0_28, %c0_29], %26 {strides = array<i32>} : memref<128x128xf32, #tpu.memory_space<vmem>>, vector<128x128xf32>,
    } else {
    }
    %c0 = arith.constant 0 : index
    %c0_2 = arith.constant 0 : index
    %5 = vector.load %arg8[%c0, %c0_2] : memref<128x128xf32, #tpu.memory_space<vmem>>, vector<128x128xf32>
    %c0_3 = arith.constant 0 : index
    %c0_4 = arith.constant 0 : index
    %c0_5 = arith.constant 0 : index
    %6 = vector.load %arg3[%c0_3, %c0_4, %c0_5] : memref<2x128x128xbf16, #tpu.memory_space<vmem>>, vector<1x128x128xbf16>
    %7 = vector.shape_cast %6 : vector<1x128x128xbf16> to vector<128x128xbf16>
    %c0_6 = arith.constant 0 : index
    %c0_7 = arith.constant 0 : index
    %c0_8 = arith.constant 0 : index
    %8 = vector.load %arg4[%c0_6, %c0_7, %c0_8] : memref<2x128x128xbf16, #tpu.memory_space<vmem>>, vector<1x128x128xbf16>
    %9 = vector.shape_cast %8 : vector<1x128x128xbf16> to vector<128x128xbf16>
    %cst = arith.constant dense<0.000000e+00> : vector<128x128xf32>
    %10 = tpu.matmul %7, %9, %cst {dimension_numbers = #tpu.dot_dimension_numbers<[1], [0], [0], [1], [0, 0, 1, 1], [], []>} : vector<128x128xbf16>, vector<128x128xbf16>, vector<128x128xf32> -> vector<128x128xf32>
    %11 = arith.addf %5, %10 : vector<128x128xf32>
    %c0_9 = arith.constant 0 : index
    %c0_10 = arith.constant 0 : index
    %12 = vector.load %arg8[%c0_9, %c0_10] : memref<128x128xf32, #tpu.memory_space<vmem>>, vector<128x128xf32>
    tpu.vector_store %arg8[%c0_9, %c0_10], %11 {strides = array<i32>} : memref<128x128xf32, #tpu.memory_space<vmem>>, vector<128x128xf32>,
    %c0_11 = arith.constant 0 : index
    %c0_12 = arith.constant 0 : index
    %13 = vector.load %arg8[%c0_11, %c0_12] : memref<128x128xf32, #tpu.memory_space<vmem>>, vector<128x128xf32>
    %c1 = arith.constant 1 : index
    %c0_13 = arith.constant 0 : index
    %c0_14 = arith.constant 0 : index
    %14 = vector.load %arg3[%c1, %c0_13, %c0_14] : memref<2x128x128xbf16, #tpu.memory_space<vmem>>, vector<1x128x128xbf16>
    %15 = vector.shape_cast %14 : vector<1x128x128xbf16> to vector<128x128xbf16>
    %c1_15 = arith.constant 1 : index
    %c0_16 = arith.constant 0 : index
    %c0_17 = arith.constant 0 : index
    %16 = vector.load %arg4[%c1_15, %c0_16, %c0_17] : memref<2x128x128xbf16, #tpu.memory_space<vmem>>, vector<1x128x128xbf16>
    %17 = vector.shape_cast %16 : vector<1x128x128xbf16> to vector<128x128xbf16>
    %cst_18 = arith.constant dense<0.000000e+00> : vector<128x128xf32>
    %18 = tpu.matmul %15, %17, %cst_18 {dimension_numbers = #tpu.dot_dimension_numbers<[1], [0], [0], [1], [0, 0, 1, 1], [], []>} : vector<128x128xbf16>, vector<128x128xbf16>, vector<128x128xf32> -> vector<128x128xf32>
    %19 = arith.addf %13, %18 : vector<128x128xf32>
    %c0_19 = arith.constant 0 : index
    %c0_20 = arith.constant 0 : index
    %20 = vector.load %arg8[%c0_19, %c0_20] : memref<128x128xf32, #tpu.memory_space<vmem>>, vector<128x128xf32>
    tpu.vector_store %arg8[%c0_19, %c0_20], %19 {strides = array<i32>} : memref<128x128xf32, #tpu.memory_space<vmem>>, vector<128x128xf32>,
    return
  }
  func.func @transform_0(%arg0: i32, %arg1: i32, %arg2: i32) -> (i32, i32, i32) {
    %c0_i32 = arith.constant 0 : i32
    return %arg1, %arg0, %arg2 : i32, i32, i32
  }
  func.func @transform_1(%arg0: i32, %arg1: i32, %arg2: i32) -> (i32, i32, i32) {
    %c0_i32 = arith.constant 0 : i32
    %c0_i32_0 = arith.constant 0 : i32
    return %arg1, %arg2, %c0_i32 : i32, i32, i32
  }
  func.func @transform_2(%arg0: i32, %arg1: i32, %arg2: i32) -> (i32, i32) {
    %c0_i32 = arith.constant 0 : i32
    %c0_i32_0 = arith.constant 0 : i32
    %c0_i32_1 = arith.constant 0 : i32
    return %c0_i32, %c0_i32_0 : i32, i32
  }
  func.func @transform_3(%arg0: i32, %arg1: i32, %arg2: i32) -> (i32, i32) {
    %c0_i32 = arith.constant 0 : i32
    %c0_i32_0 = arith.constant 0 : i32
    %c0_i32_1 = arith.constant 0 : i32
    return %c0_i32, %c0_i32_0 : i32, i32
  }
  func.func @transform_4(%arg0: i32, %arg1: i32, %arg2: i32) -> (i32, i32) {
    %c0_i32 = arith.constant 0 : i32
    %c0_i32_0 = arith.constant 0 : i32
    return %arg0, %c0_i32 : i32, i32
  }
  func.func @transform_5(%arg0: i32, %arg1: i32, %arg2: i32) -> (i32, i32) {
    %c0_i32 = arith.constant 0 : i32
    %c0_i32_0 = arith.constant 0 : i32
    return %arg0, %c0_i32 : i32, i32
  }
}

</mosaic_0001>

<bundles_post_ra>
// kernel: tpu_custom_call.1
= control target key start
LH: loop header
LB: loop body
LE: loop exit
PB: predicated region body
PF: predicated region fallthrough
CT: control target
= control target key end

     0   :  { %10 = vsyncpa [#allocation3], 0  ;;  %s1552_s0 = inlined_call_operand.hbm [shape: bf16[2,128,128], index: 0, kind: input, shape index: {}]   ;;  %s1553_s1 = inlined_call_operand.hbm [shape: bf16[2,128,128], index: 1, kind: input, shape index: {}]   ;;  %s1554_s2 = inlined_call_operand.vmem [shape: f32[1,128], index: 2, kind: input, shape index: {}]   ;;  %s1555_s3 = inlined_call_operand.hbm [shape: bf16[128,128], index: 3, kind: input, shape index: {}]   ;;  %s1556_s4 = inlined_call_operand.hbm [shape: bf16[128,128], index: 4, kind: input, shape index: {}]   ;;  %s1557_s5 = inlined_call_operand.hbm [shape: f32[128,128], index: 5, kind: output, shape index: {}]  }
   0x1   :  { %11 = vsyncpa [#allocation6], 0 }
   0x2   :  { %12 = vsyncpa [#allocation9], 0 }
   0x3   :  { %13 = vsyncpa [#allocation4], 0  ;;  %s1394_s18 = smov [#allocation5]   ;;  %s1395_s20 = smov [#allocation2]  }
   0x4   :  { %s31_s19 = sshll.u32 %s1394_s18, 4  ;;  %s19_s21 = sshll.u32 %s1395_s20, 4  ;;  %s32_s19 = int_to_ptr.vmem [resolvable:$true] %s31_s19  ;;  %s1433_s21 = int_to_ptr.vmem [resolvable:$true] %s19_s21 }
   0x5   :  { %s1276_s24 = scalar_lea.hbm %s1553_s1, 2048 }
   0x6   :  { %p1277_p0 = scmp.ne.s32.totalorder %s1553_s1, %s1276_s24  ;;  %p1280_p1 = scmp.lt.u32.totalorder %s1276_s24, %s1553_s1 }
   0x8   :  { %p1282_p2 = pnand %p1280_p1, %p1277_p0 }
   0xa   :  { %1285 = shalt.err (!%p1282_p2)
}
   0xb   :  { %s1286_s29 = scalar_lea.vmem %s32_s19, 2048  ;;  %p1291_p4 = scmp.lt.s32.totalorder %s32_s19, %s32_s19 }
   0xc   :  { %p1287_p3 = scmp.ne.s32.totalorder %s32_s19, %s1286_s29  ;;  %p1292_p5 = scmp.lt.s32.totalorder %s1286_s29, %s1286_s29 }
   0xe   :  { %p1293_p6 = por %p1292_p5, %p1291_p4 }
  0x10   :  { %p1294_p7 = pnand %p1293_p6, %p1287_p3 }
  0x12   :  { %1297 = shalt.err (!%p1294_p7)
}
  0x13   :  { %s1396_s30 = smov 64   ;;  %s1397_s6 = smov 4  }
  0x14   :  { %37 = dma.hbm_to_vmem [thread:$0]  %s1553_s1, 2048, %s32_s19, [#allocation6], %s1396_s30, %s1396_s30, %s1397_s6  }
  0x15   :  { %s1298_s11 = scalar_lea.hbm %s1552_s0, 2048 }
  0x16   :  { %p1299_p8 = scmp.ne.s32.totalorder %s1552_s0, %s1298_s11  ;;  %p1302_p9 = scmp.lt.u32.totalorder %s1298_s11, %s1552_s0 }
  0x18   :  { %p1304_p10 = pnand %p1302_p9, %p1299_p8 }
  0x1a   :  { %1307 = shalt.err (!%p1304_p10)
}
  0x1b   :  { %s1308_s16 = scalar_lea.vmem %s1433_s21, 2048  ;;  %p1313_p12 = scmp.lt.s32.totalorder %s1433_s21, %s1433_s21 }
  0x1c   :  { %p1309_p11 = scmp.ne.s32.totalorder %s1433_s21, %s1308_s16  ;;  %p1314_p13 = scmp.lt.s32.totalorder %s1308_s16, %s1308_s16 }
  0x1e   :  { %p1315_p0 = por %p1314_p13, %p1313_p12 }
  0x20   :  { %p1316_p1 = pnand %p1315_p0, %p1309_p11 }
  0x22   :  { %1319 = shalt.err (!%p1316_p1)
}
  0x23   :  { %25 = dma.hbm_to_vmem [thread:$0]  %s1552_s0, 2048, %s1433_s21, [#allocation3], %s1396_s30, %s1396_s30, %s1397_s6  }
  0x24   :  { %s1398_s18 = smov [#allocation7]   ;;  %s1399_s20 = smov [#allocation8]  }
  0x25   :  { %s45_s19 = sshll.u32 %s1398_s18, 4  ;;  %s57_s22 = sshll.u32 %s1399_s20, 4  ;;  %s46_s19 = int_to_ptr.vmem [resolvable:$true] %s45_s19  ;;  %s1470_s22 = int_to_ptr.vmem [resolvable:$true] %s57_s22 }
  0x26   :  { %s1320_s25 = scalar_lea.hbm %s1555_s3, 1024 }
  0x27   :  { %p1321_p2 = scmp.ne.s32.totalorder %s1555_s3, %s1320_s25  ;;  %p1324_p3 = scmp.lt.u32.totalorder %s1320_s25, %s1555_s3 }
  0x29   :  { %p1326_p4 = pnand %p1324_p3, %p1321_p2 }
  0x2b   :  { %1329 = shalt.err (!%p1326_p4)
}
  0x2c   :  { %s1330_s0 = scalar_lea.vmem %s46_s19, 1024  ;;  %p1335_p6 = scmp.lt.s32.totalorder %s46_s19, %s46_s19 }
  0x2d   :  { %p1331_p5 = scmp.ne.s32.totalorder %s46_s19, %s1330_s0  ;;  %p1336_p7 = scmp.lt.s32.totalorder %s1330_s0, %s1330_s0 }
  0x2f   :  { %p1337_p8 = por %p1336_p7, %p1335_p6 }
  0x31   :  { %p1338_p9 = pnand %p1337_p8, %p1331_p5 }
  0x33   :  { %1341 = shalt.err (!%p1338_p9)
}
  0x34   :  { %51 = dma.hbm_to_vmem [thread:$0]  %s1555_s3, 1024, %s46_s19, [#allocation6], %s1396_s30, %s1396_s30, %s1397_s6  }
  0x35   :  { %s1342_s10 = scalar_lea.hbm %s1556_s4, 1024 }
  0x36   :  { %p1343_p10 = scmp.ne.s32.totalorder %s1556_s4, %s1342_s10  ;;  %p1346_p11 = scmp.lt.u32.totalorder %s1342_s10, %s1556_s4 }
  0x38   :  { %p1348_p12 = pnand %p1346_p11, %p1343_p10 }
  0x3a   :  { %1351 = shalt.err (!%p1348_p12)
}
  0x3b   :  { %s1352_s15 = scalar_lea.vmem %s1470_s22, 1024  ;;  %p1357_p0 = scmp.lt.s32.totalorder %s1470_s22, %s1470_s22 }
  0x3c   :  { %p1353_p13 = scmp.ne.s32.totalorder %s1470_s22, %s1352_s15  ;;  %p1358_p1 = scmp.lt.s32.totalorder %s1352_s15, %s1352_s15 }
  0x3e   :  { %p1359_p2 = por %p1358_p1, %p1357_p0 }
  0x40   :  { %p1360_p3 = pnand %p1359_p2, %p1353_p13 }
  0x42   :  { %1363 = shalt.err (!%p1360_p3)
}
  0x43   :  { %63 = dma.hbm_to_vmem [thread:$0]  %s1556_s4, 1024, %s1470_s22, [#allocation9], %s1396_s30, %s1396_s30, %s1397_s6  }
  0x44   :  { %1386 = dma.done.wait [#allocation3], 2048  }
  0x45   :  { %1387 = vsyncadd [#allocation3], 4294965248 }
  0x46   :  { %1388 = dma.done.wait [#allocation6], 3072  }
  0x47   :  { %1389 = vsyncadd [#allocation6], 4294964224 }
  0x48   :  { %1390 = dma.done.wait [#allocation9], 1024  }
  0x49   :  { %1391 = vsyncadd [#allocation9], 4294966272  ;;  %v1228_v0 = vld [vmem:[#allocation7] sm:$0xff]   ;;  %v1230_v2 = vld [vmem:[#allocation7 + $0x8] sm:$0xff]  }
  0x4a   :  { %v1229_v1 = vld [vmem:[#allocation5] sm:$0xff]   ;;  %1011 = vmatprep.subr.bf16.mxu1 %v1228_v0  ;;  %v1231_v3 = vld [vmem:[#allocation5 + $0x8] sm:$0xff]   ;;  %v1232_v4 = vld [vmem:[#allocation7 + $0x10] sm:$0xff]  }
  0x4b   :  { %1043 = vmatprep.subr.bf16.mxu0 %v1229_v1  ;;  %1012 = vmatpush3.bf16.msra.mxu1 %v1228_v0  ;;  %v1233_v5 = vld [vmem:[#allocation5 + $0x10] sm:$0xff]   ;;  %v1234_v6 = vld [vmem:[#allocation7 + $0x18] sm:$0xff]   ;;  %v1236_v8 = vld [vmem:[#allocation7 + $0x20] sm:$0xff]  }
  0x4c   :  { %1044 = vmatpush3.bf16.msra.mxu0 %v1229_v1  ;;  %1013 = vmatprep.subr.bf16.mxu1 %v1230_v2  ;;  %v1235_v7 = vld [vmem:[#allocation5 + $0x18] sm:$0xff]   ;;  %v1237_v9 = vld [vmem:[#allocation5 + $0x20] sm:$0xff]   ;;  %v1238_v10 = vld [vmem:[#allocation7 + $0x28] sm:$0xff]  }
  0x4d   :  { %1045 = vmatprep.subr.bf16.mxu0 %v1231_v3  ;;  %v1239_v11 = vld [vmem:[#allocation5 + $0x28] sm:$0xff]   ;;  %v1244_v12 = vld [vmem:[#allocation8] sm:$0xff]   ;;  %v1240_v14 = vld [vmem:[#allocation7 + $0x30] sm:$0xff]  }
  0x4e   :  { %v1245_v13 = vld [vmem:[#allocation2] sm:$0xff]   ;;  %1027 = vmatprep.mubr.bf16.mxu1 %v1244_v12  ;;  %v1241_v15 = vld [vmem:[#allocation5 + $0x30] sm:$0xff]   ;;  %v1242_v16 = vld [vmem:[#allocation7 + $0x38] sm:$0xff]  }
  0x4f   :  { %1014 = vmatpush3.bf16.msra.mxu1 %v1230_v2  ;;  %1059 = vmatprep.mubr.bf16.mxu0 %v1245_v13  ;;  %v1243_v17 = vld [vmem:[#allocation5 + $0x38] sm:$0xff]   ;;  %v1248_v18 = vld [vmem:[#allocation5 + $0x40] sm:$0xff]   ;;  %v1246_v19 = vld [vmem:[#allocation8 + $0x8] sm:$0xff]  }
  0x50   :  { %1046 = vmatpush3.bf16.msra.mxu0 %v1231_v3  ;;  %1015 = vmatprep.subr.bf16.mxu1 %v1232_v4  ;;  %v1247_v20 = vld [vmem:[#allocation2 + $0x8] sm:$0xff]   ;;  %v1250_v22 = vld [vmem:[#allocation8 + $0x10] sm:$0xff]   ;;  %v1252_v25 = vld [vmem:[#allocation8 + $0x18] sm:$0xff]  }
  0x51   :  { %1047 = vmatprep.subr.bf16.mxu0 %v1233_v5  ;;  %v1249_v21 = vld [vmem:[#allocation5 + $0x48] sm:$0xff]   ;;  %v1251_v23 = vld [vmem:[#allocation2 + $0x10] sm:$0xff]   ;;  %v1253_v26 = vld [vmem:[#allocation2 + $0x18] sm:$0xff]  }
  0x52   :  { %v1254_v24 = vld [vmem:[#allocation5 + $0x50] sm:$0xff]   ;;  %v1255_v27 = vld [vmem:[#allocation5 + $0x58] sm:$0xff]   ;;  %v1256_v28 = vld [vmem:[#allocation8 + $0x20] sm:$0xff]  }
  0x53   :  { %1016 = vmatpush3.bf16.msra.mxu1 %v1232_v4  ;;  %v1257_v29 = vld [vmem:[#allocation2 + $0x20] sm:$0xff]   ;;  %v1258_v31 = vld [vmem:[#allocation8 + $0x28] sm:$0xff]   ;;  %v1262_v34 = vld [vmem:[#allocation8 + $0x30] sm:$0xff]  }
  0x54   :  { %1048 = vmatpush3.bf16.msra.mxu0 %v1233_v5  ;;  %1017 = vmatprep.subr.bf16.mxu1 %v1234_v6  ;;  %v1260_v30 = vld [vmem:[#allocation5 + $0x60] sm:$0xff]   ;;  %v1259_v32 = vld [vmem:[#allocation2 + $0x28] sm:$0xff]   ;;  %v1263_v35 = vld [vmem:[#allocation2 + $0x30] sm:$0xff]  }
  0x55   :  { %1049 = vmatprep.subr.bf16.mxu0 %v1235_v7  ;;  %v1261_v33 = vld [vmem:[#allocation5 + $0x68] sm:$0xff]   ;;  %v1266_v36 = vld [vmem:[#allocation5 + $0x70] sm:$0xff]   ;;  %v1264_v37 = vld [vmem:[#allocation8 + $0x38] sm:$0xff]  }
  0x56   :  { %v1265_v38 = vld [vmem:[#allocation2 + $0x38] sm:$0xff]   ;;  %v1268_v40 = vld [vmem:[#allocation2 + $0x40] sm:$0xff]   ;;  %v1271_v42 = vld [vmem:[#allocation2 + $0x68] sm:$0xff]  }
  0x57   :  { %1018 = vmatpush3.bf16.msra.mxu1 %v1234_v6  ;;  %v1267_v39 = vld [vmem:[#allocation5 + $0x78] sm:$0xff]   ;;  %v1270_v41 = vld [vmem:[#allocation2 + $0x60] sm:$0xff]   ;;  %v1269_v43 = vld [vmem:[#allocation2 + $0x48] sm:$0xff]  }
  0x58   :  { %1050 = vmatpush3.bf16.msra.mxu0 %v1235_v7  ;;  %1019 = vmatprep.subr.bf16.mxu1 %v1236_v8  ;;  %v1274_v44 = vld [vmem:[#allocation2 + $0x70] sm:$0xff]   ;;  %v1275_v46 = vld [vmem:[#allocation2 + $0x78] sm:$0xff]   ;;  %v1518_v56 = vld [vmem:[%s1554_s2] ss:$0 sm:$0xff]  ;;  %s1400_s2 = smov [#allocation10]  }
  0x59   :  { %1051 = vmatprep.subr.bf16.mxu0 %v1237_v9  ;;  %v1272_v45 = vld [vmem:[#allocation2 + $0x50] sm:$0xff]   ;;  %v1273_v47 = vld [vmem:[#allocation2 + $0x58] sm:$0xff]   ;;  %s900_s6 = sshll.u32 %s1400_s2, 4  ;;  %s901_s6 = int_to_ptr.vmem [resolvable:$true] %s900_s6 }
  0x5a   :  { %s1364_s1 = scalar_lea.vmem %s901_s6, 2048  ;;  %p1369_p5 = scmp.lt.s32.totalorder %s901_s6, %s901_s6 }
  0x5b   :  { %1020 = vmatpush3.bf16.msra.mxu1 %v1236_v8  ;;  %p1365_p4 = scmp.ne.s32.totalorder %s901_s6, %s1364_s1  ;;  %p1370_p6 = scmp.lt.s32.totalorder %s1364_s1, %s1364_s1 }
  0x5c   :  { %1052 = vmatpush3.bf16.msra.mxu0 %v1237_v9  ;;  %1021 = vmatprep.subr.bf16.mxu1 %v1238_v10 }
  0x5d   :  { %1053 = vmatprep.subr.bf16.mxu0 %v1239_v11  ;;  %p1371_p7 = por %p1370_p6, %p1369_p5 }
  0x5f   :  { %1022 = vmatpush3.bf16.msra.mxu1 %v1238_v10  ;;  %p1372_p8 = pnand %p1371_p7, %p1365_p4 }
  0x60   :  { %1054 = vmatpush3.bf16.msra.mxu0 %v1239_v11  ;;  %1023 = vmatprep.subr.bf16.mxu1 %v1240_v14 }
  0x61   :  { %1055 = vmatprep.subr.bf16.mxu0 %v1241_v15 }
  0x63   :  { %1024 = vmatpush3.bf16.msra.mxu1 %v1240_v14 }
  0x64   :  { %1056 = vmatpush3.bf16.msra.mxu0 %v1241_v15  ;;  %1025 = vmatprep.subr.bf16.mxu1 %v1242_v16 }
  0x65   :  { %1057 = vmatprep.subr.bf16.mxu0 %v1243_v17 }
  0x67   :  { %1026 = vmatpush3.bf16.msra.mxu1 %v1242_v16 }
  0x68   :  { %1058 = vmatpush3.bf16.msra.mxu0 %v1243_v17  ;;  %1107 = vmatprep.subr.bf16.mxu1 %v1248_v18 }
  0x69   :  { %1075 = vmatprep.subr.bf16.mxu0 %v1248_v18 }
  0x6a   :  { %1028 = vmatmul.mubr.bf16.vlgmr.msra.gmra.mrb[0].mxu1 %v1246_v19 }
  0x6b   :  { %1060 = vmatmul.mubr.bf16.vlgmr.msra.gmra.mrb[0].mxu0 %v1247_v20  ;;  %1115 = vmatpush3.bf16.msra.mxu1 %v1248_v18 }
  0x6c   :  { %1076 = vmatpush3.bf16.msra.mxu0 %v1248_v18  ;;  %1108 = vmatprep.subr.bf16.mxu1 %v1249_v21 }
  0x6d   :  { %1077 = vmatprep.subr.bf16.mxu0 %v1249_v21  ;;  %1031 = vmatprep.mubr.bf16.mxu1 %v1250_v22 }
  0x6e   :  { %1063 = vmatprep.mubr.bf16.mxu0 %v1251_v23 }
  0x6f   :  { %1116 = vmatpush3.bf16.msra.mxu1 %v1249_v21 }
  0x70   :  { %1078 = vmatpush3.bf16.msra.mxu0 %v1249_v21  ;;  %1109 = vmatprep.subr.bf16.mxu1 %v1254_v24 }
  0x71   :  { %1079 = vmatprep.subr.bf16.mxu0 %v1254_v24 }
  0x72   :  { %1032 = vmatmul.mubr.bf16.gmra.mrb[4].mxu1 %v1252_v25 }
  0x73   :  { %1064 = vmatmul.mubr.bf16.gmra.mrb[4].mxu0 %v1253_v26  ;;  %1117 = vmatpush3.bf16.msra.mxu1 %v1254_v24 }
  0x74   :  { %1080 = vmatpush3.bf16.msra.mxu0 %v1254_v24  ;;  %1110 = vmatprep.subr.bf16.mxu1 %v1255_v27 }
  0x75   :  { %1081 = vmatprep.subr.bf16.mxu0 %v1255_v27  ;;  %1035 = vmatprep.mubr.bf16.mxu1 %v1256_v28 }
  0x76   :  { %1067 = vmatprep.mubr.bf16.mxu0 %v1257_v29 }
  0x77   :  { %1118 = vmatpush3.bf16.msra.mxu1 %v1255_v27 }
  0x78   :  { %1082 = vmatpush3.bf16.msra.mxu0 %v1255_v27  ;;  %1111 = vmatprep.subr.bf16.mxu1 %v1260_v30 }
  0x79   :  { %1083 = vmatprep.subr.bf16.mxu0 %v1260_v30 }
  0x7a   :  { %1036 = vmatmul.mubr.bf16.gmra.mrb[8].mxu1 %v1258_v31 }
  0x7b   :  { %1068 = vmatmul.mubr.bf16.gmra.mrb[8].mxu0 %v1259_v32  ;;  %1119 = vmatpush3.bf16.msra.mxu1 %v1260_v30 }
  0x7c   :  { %1084 = vmatpush3.bf16.msra.mxu0 %v1260_v30  ;;  %1112 = vmatprep.subr.bf16.mxu1 %v1261_v33 }
  0x7d   :  { %1085 = vmatprep.subr.bf16.mxu0 %v1261_v33  ;;  %1039 = vmatprep.mubr.bf16.mxu1 %v1262_v34 }
  0x7e   :  { %1071 = vmatprep.mubr.bf16.mxu0 %v1263_v35 }
  0x7f   :  { %1120 = vmatpush3.bf16.msra.mxu1 %v1261_v33 }
  0x80   :  { %1086 = vmatpush3.bf16.msra.mxu0 %v1261_v33  ;;  %1113 = vmatprep.subr.bf16.mxu1 %v1266_v36 }
  0x81   :  { %1087 = vmatprep.subr.bf16.mxu0 %v1266_v36 }
  0x82   :  { %1040 = vmatmul.mubr.bf16.gmra.mrb[12].mxu1 %v1264_v37 }
  0x83   :  { %1072 = vmatmul.mubr.bf16.gmra.mrb[12].mxu0 %v1265_v38  ;;  %1121 = vmatpush3.bf16.msra.mxu1 %v1266_v36 }
  0x84   :  { %1088 = vmatpush3.bf16.msra.mxu0 %v1266_v36  ;;  %1114 = vmatprep.subr.bf16.mxu1 %v1267_v39 }
  0x85   :  { %1089 = vmatprep.subr.bf16.mxu0 %v1267_v39  ;;  %1091 = vmatprep.mubr.bf16.mxu0 %v1268_v40 }
  0x86   :  { %1099 = vmatprep.mubr.bf16.mxu1 %v1270_v41 }
  0x87   :  { %1122 = vmatpush3.bf16.msra.mxu1 %v1267_v39 }
  0x88   :  { %1090 = vmatpush3.bf16.msra.mxu0 %v1267_v39 }
  0x8a   :  { %1100 = vmatmul.mubr.bf16.vlgmr.msra.gmra.mrb[16].mxu1 %v1271_v42 }
  0x8b   :  { %1092 = vmatmul.mubr.bf16.vlgmr.msra.gmra.mrb[0].mxu0 %v1269_v43  ;;  %1103 = vmatprep.mubr.bf16.mxu1 %v1274_v44 }
  0x8c   :  { %1095 = vmatprep.mubr.bf16.mxu0 %v1272_v45 }
  0x92   :  { %1104 = vmatmul.mubr.bf16.gmra.mrb[20].mxu1 %v1275_v46 }
  0x93   :  { %1096 = vmatmul.mubr.bf16.gmra.mrb[4].mxu0 %v1273_v47 }
 0x13d   :  { %v1029_v48 = vpop.f32.mrb[0].mxu1 }
 0x13e   :  { %v246_v49 = vpop.f32.mrb[1].mxu1  ;;  %v317_v25 = vadd.f32 %v1029_v48, %v1518_v56 }
 0x13f   :  { %v1030_v50 = vpop.f32.mrb[2].mxu1  ;;  %v315_v27 = vadd.f32 %v1518_v56, %v246_v49 }
 0x140   :  { %v249_v51 = vpop.f32.mrb[3].mxu1  ;;  %v318_v31 = vadd.f32 %v1030_v50, %v1518_v56 }
 0x141   :  { %v316_v36 = vadd.f32 %v1518_v56, %v249_v51 }
 0x145   :  { %v1507_v52 = vpop.f32.mrb[4].mxu1 }
 0x146   :  { %v1509_v53 = vpop.f32.mrb[5].mxu1  ;;  %v321_v45 = vadd.f32 %v1507_v52, %v1518_v56 }
 0x147   :  { %v1511_v54 = vpop.f32.mrb[6].mxu1  ;;  %v319_v47 = vadd.f32 %v1518_v56, %v1509_v53 }
 0x148   :  { %v1513_v55 = vpop.f32.mrb[7].mxu1  ;;  %v322_v51 = vadd.f32 %v1511_v54, %v1518_v56 }
 0x14d   :  { %v1037_v57 = vpop.f32.mrb[8].mxu1 }
 0x14e   :  { %v325_v58 = vadd.f32 %v1037_v57, %v1518_v56  ;;  %v278_v59 = vpop.f32.mrb[9].mxu1  ;;  %v1069_v60 = vpop.f32.mrb[8].mxu0 }
 0x14f   :  { %v323_v61 = vadd.f32 %v1518_v56, %v278_v59  ;;  %v1038_v62 = vpop.f32.mrb[10].mxu1  ;;  %v557_v63 = vpop.f32.mrb[9].mxu0 }
 0x150   :  { %v1158_v0 = vadd.f32 %v1069_v60, %v325_v58  ;;  %v326_v1 = vadd.f32 %v1038_v62, %v1518_v56  ;;  %v281_v2 = vpop.f32.mrb[11].mxu1  ;;  %v1070_v3 = vpop.f32.mrb[10].mxu0 }
 0x151   :  { %v1165_v4 = vadd.f32 %v557_v63, %v323_v61  ;;  %v324_v5 = vadd.f32 %v1518_v56, %v281_v2  ;;  %v560_v6 = vpop.f32.mrb[11].mxu0  ;;  %v320_v61 = vadd.f32 %v1518_v56, %v1513_v55 }
 0x152   :  { %v1172_v7 = vadd.f32 %v1070_v3, %v326_v1 }
 0x153   :  { %v1179_v8 = vadd.f32 %v560_v6, %v324_v5 }
 0x155   :  { %v1041_v9 = vpop.f32.mrb[12].mxu1 }
 0x156   :  { %v329_v10 = vadd.f32 %v1041_v9, %v1518_v56  ;;  %v294_v11 = vpop.f32.mrb[13].mxu1  ;;  %v1073_v12 = vpop.f32.mrb[12].mxu0 }
 0x157   :  { %v327_v13 = vadd.f32 %v1518_v56, %v294_v11  ;;  %v1042_v14 = vpop.f32.mrb[14].mxu1  ;;  %v573_v15 = vpop.f32.mrb[13].mxu0 }
 0x158   :  { %v1186_v16 = vadd.f32 %v1073_v12, %v329_v10  ;;  %v330_v17 = vadd.f32 %v1042_v14, %v1518_v56  ;;  %v297_v18 = vpop.f32.mrb[15].mxu1  ;;  %v1074_v19 = vpop.f32.mrb[14].mxu0 }
 0x159   :  { %v1193_v20 = vadd.f32 %v573_v15, %v327_v13  ;;  %v328_v21 = vadd.f32 %v1518_v56, %v297_v18  ;;  %v576_v22 = vpop.f32.mrb[15].mxu0 }
 0x15a   :  { %v1200_v23 = vadd.f32 %v1074_v19, %v330_v17 }
 0x15b   :  { %v1207_v24 = vadd.f32 %v576_v22, %v328_v21 }
 0x15d   :  { %v1101_v26 = vpop.f32.mrb[16].mxu1 }
 0x15e   :  { %v1093_v28 = vpop.f32.mrb[0].mxu0  ;;  %v1161_v29 = vadd.f32 %v1158_v0, %v1101_v26  ;;  %v832_v30 = vpop.f32.mrb[17].mxu1 }
 0x15f   :  { %v1126_v32 = vadd.f32 %v1093_v28, %v317_v25  ;;  %v800_v33 = vpop.f32.mrb[1].mxu0  ;;  %v1168_v34 = vadd.f32 %v1165_v4, %v832_v30  ;;  %v1102_v35 = vpop.f32.mrb[18].mxu1 }
 0x160   :  { %v1130_v37 = vadd.f32 %v800_v33, %v315_v27  ;;  %889 = vst [vmem:[#allocation10 + $0x50] sm:$0xff] %v1161_v29  ;;  %v1094_v38 = vpop.f32.mrb[2].mxu0  ;;  %v1175_v39 = vadd.f32 %v1172_v7, %v1102_v35  ;;  %v835_v40 = vpop.f32.mrb[19].mxu1 }
 0x161   :  { %881 = vst [vmem:[#allocation10 + $0x10] sm:$0xff] %v1126_v32  ;;  %v1134_v41 = vadd.f32 %v1094_v38, %v318_v31  ;;  %887 = vst [vmem:[#allocation10 + $0x40] sm:$0xff] %v1168_v34  ;;  %v803_v42 = vpop.f32.mrb[3].mxu0  ;;  %v1182_v43 = vadd.f32 %v1179_v8, %v835_v40 }
 0x162   :  { %879 = vst [vmem:[#allocation10] sm:$0xff] %v1130_v37  ;;  %v1138_v44 = vadd.f32 %v803_v42, %v316_v36  ;;  %890 = vst [vmem:[#allocation10 + $0x58] sm:$0xff] %v1175_v39 }
 0x163   :  { %882 = vst [vmem:[#allocation10 + $0x18] sm:$0xff] %v1134_v41  ;;  %888 = vst [vmem:[#allocation10 + $0x48] sm:$0xff] %v1182_v43 }
 0x164   :  { %880 = vst [vmem:[#allocation10 + $0x8] sm:$0xff] %v1138_v44 }
 0x165   :  { %v1105_v46 = vpop.f32.mrb[20].mxu1 }
 0x166   :  { %v1097_v48 = vpop.f32.mrb[4].mxu0  ;;  %v1189_v49 = vadd.f32 %v1186_v16, %v1105_v46  ;;  %v848_v50 = vpop.f32.mrb[21].mxu1 }
 0x167   :  { %v1142_v57 = vadd.f32 %v1097_v48, %v321_v45  ;;  %v816_v58 = vpop.f32.mrb[5].mxu0  ;;  %v1196_v59 = vadd.f32 %v1193_v20, %v848_v50  ;;  %v1106_v60 = vpop.f32.mrb[22].mxu1 }
 0x168   :  { %v1146_v52 = vadd.f32 %v816_v58, %v319_v47  ;;  %893 = vst [vmem:[#allocation10 + $0x70] sm:$0xff] %v1189_v49  ;;  %v1098_v62 = vpop.f32.mrb[6].mxu0  ;;  %v1203_v63 = vadd.f32 %v1200_v23, %v1106_v60  ;;  %v851_v53 = vpop.f32.mrb[23].mxu1 }
 0x169   :  { %885 = vst [vmem:[#allocation10 + $0x30] sm:$0xff] %v1142_v57  ;;  %v1150_v0 = vadd.f32 %v1098_v62, %v322_v51  ;;  %891 = vst [vmem:[#allocation10 + $0x60] sm:$0xff] %v1196_v59  ;;  %v819_v1 = vpop.f32.mrb[7].mxu0  ;;  %v1210_v2 = vadd.f32 %v1207_v24, %v851_v53 }
 0x16a   :  { %883 = vst [vmem:[#allocation10 + $0x20] sm:$0xff] %v1146_v52  ;;  %v1154_v54 = vadd.f32 %v819_v1, %v320_v61  ;;  %894 = vst [vmem:[#allocation10 + $0x78] sm:$0xff] %v1203_v63 }
 0x16b   :  { %886 = vst [vmem:[#allocation10 + $0x38] sm:$0xff] %v1150_v0  ;;  %892 = vst [vmem:[#allocation10 + $0x68] sm:$0xff] %v1210_v2 }
 0x16c   :  { %884 = vst [vmem:[#allocation10 + $0x28] sm:$0xff] %v1154_v54 }
 0x16d   :  { %1375 = shalt.err (!%p1372_p8)
}
 0x16e   :  { %s1376_s19 = scalar_lea.hbm %s1557_s5, 2048 }
 0x16f   :  { %p1377_p9 = scmp.ne.s32.totalorder %s1557_s5, %s1376_s19  ;;  %p1380_p10 = scmp.lt.u32.totalorder %s1376_s19, %s1557_s5 }
 0x171   :  { %p1382_p11 = pnand %p1380_p10, %p1377_p9 }
 0x173   :  { %1385 = shalt.err (!%p1382_p11)
}
 0x174   :  { %s1401_s25 = smov 128   ;;  %s1402_s26 = smov 8  }
 0x175   :  { %906 = dma.vmem_to_hbm [thread:$0]  %s901_s6, 2048, %s1557_s5, [#allocation4], %s1401_s25, %s1401_s25, %s1402_s26  }
 0x176   :  { %1392 = dma.done.wait [#allocation4], 2048  }
 0x177   :  { %1393 = vsyncadd [#allocation4], 4294965248 }
 0x178   :  { %910 = vsyncpa [#allocation3], 1 }
 0x179   :  { %911 = vsyncpa [#allocation6], 1 }
 0x17a   :  { %912 = vsyncpa [#allocation9], 1 }
 0x17b   :  { %913 = vsyncpa [#allocation4], 1 }

</bundles_post_ra>
